<compile_context>
chip_gen: v7x
topology: tpu7x:2x2x1
jax: 0.10.0
libtpu: 0.0.40
codegen_flags: <defaults>
</compile_context>

<pallas_src>
import functools

import jax
import jax.numpy as jnp
from jax.experimental import pallas as pl
from jax.experimental.pallas import tpu as pltpu

_BLOCK_M = 512  # row tile for the 1x1-conv matmuls (sized for v7x 64 MiB VMEM too)
_PARALLEL = pltpu.CompilerParams(dimension_semantics=("parallel",))


def _round_up(x, m):
    return (x + m - 1) // m * m


def _pad_rows(x, rows):
    return x if x.shape[0] == rows else jnp.pad(x, ((0, rows - x.shape[0]), (0, 0)))


# ----------------------------------------------------------------------------
# Pallas kernels
# ----------------------------------------------------------------------------
def _pw_bn_act_kernel(x_ref, w_ref, s_ref, b_ref, o_ref, *, relu):
    """o = act((x @ w) * scale + bias)  -- 1x1 conv + folded BN (+ ReLU)."""
    acc = jnp.dot(x_ref[...], w_ref[...], preferred_element_type=jnp.float32)
    y = acc * s_ref[...] + b_ref[...]
    if relu:
        y = jnp.maximum(y, 0.0)
    o_ref[...] = y.astype(o_ref.dtype)


def _pw_bn_add_relu_kernel(x_ref, w_ref, s_ref, b_ref, id_ref, o_ref):
    """o = relu((x @ w) * scale + bias + identity)  -- conv3 + bn3 + residual + ReLU."""
    acc = jnp.dot(x_ref[...], w_ref[...], preferred_element_type=jnp.float32)
    y = acc * s_ref[...] + b_ref[...] + id_ref[...].astype(jnp.float32)
    o_ref[...] = jnp.maximum(y, 0.0).astype(o_ref.dtype)


def _pw_bn_dual_add_relu_kernel(x_ref, w_ref, s_ref, b_ref,
                                xd_ref, wd_ref, sd_ref, bd_ref, o_ref):
    """conv3+bn3 and downsample conv1x1+bn fused with the residual add + ReLU."""
    y = jnp.dot(x_ref[...], w_ref[...], preferred_element_type=jnp.float32)
    y = y * s_ref[...] + b_ref[...]
    yd = jnp.dot(xd_ref[...], wd_ref[...], preferred_element_type=jnp.float32)
    yd = yd * sd_ref[...] + bd_ref[...]
    o_ref[...] = jnp.maximum(y + yd, 0.0).astype(o_ref.dtype)


def _conv3tap_bn_relu_kernel(x_ref, w_ref, s_ref, b_ref, o_ref, *, k_taps, stride, l_out):
    """3-tap conv over a stride-phase-split input tile, fused BN + ReLU.

    x_ref: (stride, Lphase, Cin) where phase p holds padded-input rows p, p+stride,
    ... so padded_x[l*stride + k] == x_ref[k % stride, l + k // stride].  Only
    contiguous static slices are used -> no im2col, no strided loads.
    """
    acc = None
    for k in range(k_taps):
        xk = x_ref[k % stride, pl.ds(k // stride, l_out), :]
        part = jnp.dot(xk, w_ref[k], preferred_element_type=jnp.float32)
        acc = part if acc is None else acc + part
    y = acc * s_ref[...] + b_ref[...]
    o_ref[...] = jnp.maximum(y, 0.0).astype(o_ref.dtype)


# ----------------------------------------------------------------------------
# pallas_call wrappers
# ----------------------------------------------------------------------------
def conv1x1_bn_act(x, w, scale, bias, *, relu, out_dtype=jnp.bfloat16, block_m=_BLOCK_M):
    """x: (M, Cin) bf16, w: (Cin, Cout) bf16, scale/bias: (Cout,) f32."""
    M, K = x.shape
    C = w.shape[1]
    tm = M if M <= block_m else block_m
    Mp = _round_up(M, tm)
    out = pl.pallas_call(
        functools.partial(_pw_bn_act_kernel, relu=relu),
        out_shape=jax.ShapeDtypeStruct((Mp, C), out_dtype),
        grid=(Mp // tm,),
        in_specs=[
            pl.BlockSpec((tm, K), lambda i: (i, 0)),
            pl.BlockSpec((K, C), lambda i: (0, 0)),   # VMEM-resident weight
            pl.BlockSpec((1, C), lambda i: (0, 0)),
            pl.BlockSpec((1, C), lambda i: (0, 0)),
        ],
        out_specs=pl.BlockSpec((tm, C), lambda i: (i, 0)),
        compiler_params=_PARALLEL,
    )(_pad_rows(x, Mp), w, scale.reshape(1, C), bias.reshape(1, C))
    return out[:M] if Mp != M else out


def conv1x1_bn_add_relu(x, w, scale, bias, identity, *, out_dtype=jnp.bfloat16,
                        block_m=_BLOCK_M):
    M, K = x.shape
    C = w.shape[1]
    tm = M if M <= block_m else block_m
    Mp = _round_up(M, tm)
    out = pl.pallas_call(
        _pw_bn_add_relu_kernel,
        out_shape=jax.ShapeDtypeStruct((Mp, C), out_dtype),
        grid=(Mp // tm,),
        in_specs=[
            pl.BlockSpec((tm, K), lambda i: (i, 0)),
            pl.BlockSpec((K, C), lambda i: (0, 0)),
            pl.BlockSpec((1, C), lambda i: (0, 0)),
            pl.BlockSpec((1, C), lambda i: (0, 0)),
            pl.BlockSpec((tm, C), lambda i: (i, 0)),
        ],
        out_specs=pl.BlockSpec((tm, C), lambda i: (i, 0)),
        compiler_params=_PARALLEL,
    )(_pad_rows(x, Mp), w, scale.reshape(1, C), bias.reshape(1, C),
      _pad_rows(identity, Mp))
    return out[:M] if Mp != M else out


def conv1x1_bn_dual_add_relu(x, w, scale, bias, xd, wd, sd, bd, *,
                             out_dtype=jnp.bfloat16, block_m=_BLOCK_M):
    M, K = x.shape
    C = w.shape[1]
    Kd = xd.shape[1]
    tm = M if M <= block_m else block_m
    Mp = _round_up(M, tm)
    out = pl.pallas_call(
        _pw_bn_dual_add_relu_kernel,
        out_shape=jax.ShapeDtypeStruct((Mp, C), out_dtype),
        grid=(Mp // tm,),
        in_specs=[
            pl.BlockSpec((tm, K), lambda i: (i, 0)),
            pl.BlockSpec((K, C), lambda i: (0, 0)),
            pl.BlockSpec((1, C), lambda i: (0, 0)),
            pl.BlockSpec((1, C), lambda i: (0, 0)),
            pl.BlockSpec((tm, Kd), lambda i: (i, 0)),
            pl.BlockSpec((Kd, C), lambda i: (0, 0)),
            pl.BlockSpec((1, C), lambda i: (0, 0)),
            pl.BlockSpec((1, C), lambda i: (0, 0)),
        ],
        out_specs=pl.BlockSpec((tm, C), lambda i: (i, 0)),
        compiler_params=_PARALLEL,
    )(_pad_rows(x, Mp), w, scale.reshape(1, C), bias.reshape(1, C),
      _pad_rows(xd, Mp), wd, sd.reshape(1, C), bd.reshape(1, C))
    return out[:M] if Mp != M else out


def conv3x3_bn_relu(x_nlc, w_kio, scale, bias, *, stride, out_dtype=jnp.bfloat16):
    """x_nlc: (N, L, Cin) bf16, w_kio: (3, Cin, Cout) bf16 -- PyTorch conv3x3 (pad=1)."""
    N, L, Cin = x_nlc.shape
    K, _, Cout = w_kio.shape
    pad = 1
    L_out = (L + 2 * pad - K) // stride + 1
    xp = jnp.pad(x_nlc, ((0, 0), (pad, pad), (0, 0)))
    Lp = L + 2 * pad
    Lph = -(-Lp // stride)
    if stride == 1:
        phases = xp[:, None, :, :]                        # (N, 1, Lp, Cin)
    else:
        cols = []
        for p in range(stride):
            ph = xp[:, p::stride, :]
            if ph.shape[1] < Lph:
                ph = jnp.pad(ph, ((0, 0), (0, Lph - ph.shape[1]), (0, 0)))
            cols.append(ph)
        phases = jnp.stack(cols, axis=1)                  # (N, stride, Lph, Cin)

    # TODO(synk): very long sequences should additionally tile L (with halo rows);
    # here the grid only parallelizes over the batch dimension.
    return pl.pallas_call(
        functools.partial(_conv3tap_bn_relu_kernel, k_taps=K, stride=stride, l_out=L_out),
        out_shape=jax.ShapeDtypeStruct((N, L_out, Cout), out_dtype),
        grid=(N,),
        in_specs=[
            pl.BlockSpec((None, stride, Lph, Cin), lambda n: (n, 0, 0, 0)),
            pl.BlockSpec((K, Cin, Cout), lambda n: (0, 0, 0)),
            pl.BlockSpec((1, Cout), lambda n: (0, 0)),
            pl.BlockSpec((1, Cout), lambda n: (0, 0)),
        ],
        out_specs=pl.BlockSpec((None, L_out, Cout), lambda n: (n, 0, 0)),
        compiler_params=_PARALLEL,
    )(phases, w_kio, scale.reshape(1, Cout), bias.reshape(1, Cout))


# ----------------------------------------------------------------------------
# Parameter preparation (done once, outside the jitted forward)
# ----------------------------------------------------------------------------
def bn_fold(gamma, beta, mean, var, eps=1e-5):
    scale = gamma / jnp.sqrt(var + eps)
    return scale, beta - mean * scale


def prepare_bottleneck_params(p):
    prep = {"stride": int(p["stride"])}
    prep["w1"] = jnp.transpose(p["conv1"][:, :, 0]).astype(jnp.bfloat16)     # (Cin, width)
    prep["s1"], prep["b1"] = bn_fold(**p["bn1"])
    prep["w2"] = jnp.transpose(p["conv2"], (2, 1, 0)).astype(jnp.bfloat16)   # (3, width, width)
    prep["s2"], prep["b2"] = bn_fold(**p["bn2"])
    prep["w3"] = jnp.transpose(p["conv3"][:, :, 0]).astype(jnp.bfloat16)     # (width, 4*planes)
    prep["s3"], prep["b3"] = bn_fold(**p["bn3"])
    if p["downsample"] is not None:
        prep["has_downsample"] = True
        prep["wd"] = jnp.transpose(p["downsample"]["conv"][:, :, 0]).astype(jnp.bfloat16)
        prep["sd"], prep["bd"] = bn_fold(**p["downsample"]["bn"])
    else:
        prep["has_downsample"] = False
    return prep


def bottleneck1d_forward(prep, x_ncl):
    """Pallas forward for Bottleneck1d; input/output in PyTorch NCL layout."""
    stride = prep["stride"]
    x = jnp.transpose(x_ncl, (0, 2, 1)).astype(jnp.bfloat16)   # NCL -> NLC, bf16
    N, L, Cin = x.shape
    width = prep["w1"].shape[1]
    cout = prep["w3"].shape[1]

    # conv1 (1x1) + bn1 + relu
    out = conv1x1_bn_act(x.reshape(N * L, Cin), prep["w1"], prep["s1"], prep["b1"], relu=True)
    out = out.reshape(N, L, width)

    # conv2 (3x3, stride) + bn2 + relu
    out = conv3x3_bn_relu(out, prep["w2"], prep["s2"], prep["b2"], stride=stride)
    L_out = out.shape[1]
    main = out.reshape(N * L_out, width)

    # conv3 (1x1) + bn3 + residual (+ fused conv1x1+bn downsample) + relu
    if prep["has_downsample"]:
        x_ds = x[:, ::stride, :].reshape(N * L_out, Cin)
        y = conv1x1_bn_dual_add_relu(main, prep["w3"], prep["s3"], prep["b3"],
                                     x_ds, prep["wd"], prep["sd"], prep["bd"])
    else:
        identity = x.reshape(N * L, Cin)   # stride == 1 and Cin == cout here
        y = conv1x1_bn_add_relu(main, prep["w3"], prep["s3"], prep["b3"], identity)

    y = y.reshape(N, L_out, cout).astype(jnp.float32)
    return jnp.transpose(y, (0, 2, 1))     # back to NCL


# ----------------------------------------------------------------------------
# Deterministic initialization (shapes follow Bottleneck1d.__init__)
# ----------------------------------------------------------------------------
def _kaiming_conv(key, cout, cin, k):
    std = (2.0 / (cout * k)) ** 0.5
    return jax.random.normal(key, (cout, cin, k), jnp.float32) * std


def _bn_params(key, c):
    k1, k2, k3, k4 = jax.random.split(key, 4)
    return dict(
        gamma=jax.random.uniform(k1, (c,), jnp.float32, 0.5, 1.5),
        beta=jax.random.normal(k2, (c,), jnp.float32) * 0.1,
        mean=jax.random.normal(k3, (c,), jnp.float32) * 0.1,
        var=jax.random.uniform(k4, (c,), jnp.float32, 0.5, 1.5),
    )


def init_bottleneck1d_params(key, inplanes, planes, stride=1, base_width=64, groups=1):
    assert groups == 1, "TODO(synk): grouped conv3x3 not implemented"
    width = int(planes * (base_width / 64.0)) * groups
    out_c = planes * 4                      # expansion = 4
    keys = jax.random.split(key, 8)
    p = {
        "stride": stride,
        "conv1": _kaiming_conv(keys[0], width, inplanes, 1),
        "bn1": _bn_params(keys[1], width),
        "conv2": _kaiming_conv(keys[2], width, width, 3),
        "bn2": _bn_params(keys[3], width),
        "conv3": _kaiming_conv(keys[4], out_c, width, 1),
        "bn3": _bn_params(keys[5], out_c),
    }
    if stride != 1 or inplanes != out_c:
        p["downsample"] = dict(conv=_kaiming_conv(keys[6], out_c, inplanes, 1),
                               bn=_bn_params(keys[7], out_c))
    else:
        p["downsample"] = None
    return p


# ----------------------------------------------------------------------------
# Pure-JAX (f32) reference for correctness checking
# ----------------------------------------------------------------------------
def _ref_conv1d(x_ncl, w_oik, stride, pad):
    return jax.lax.conv_general_dilated(
        x_ncl, w_oik, window_strides=(stride,), padding=[(pad, pad)],
        dimension_numbers=("NCH", "OIH", "NCH"))


def _ref_bn(x_ncl, bn, eps=1e-5):
    g = bn["gamma"][None, :, None]
    b = bn["beta"][None, :, None]
    m = bn["mean"][None, :, None]
    v = bn["var"][None, :, None]
    return (x_ncl - m) * (g / jnp.sqrt(v + eps)) + b


def bottleneck1d_reference(p, x_ncl):
    out = jax.nn.relu(_ref_bn(_ref_conv1d(x_ncl, p["conv1"], 1, 0), p["bn1"]))
    out = jax.nn.relu(_ref_bn(_ref_conv1d(out, p["conv2"], p["stride"], 1), p["bn2"]))
    out = _ref_bn(_ref_conv1d(out, p["conv3"], 1, 0), p["bn3"])
    if p["downsample"] is not None:
        identity = _ref_bn(_ref_conv1d(x_ncl, p["downsample"]["conv"], p["stride"], 0),
                           p["downsample"]["bn"])
    else:
        identity = x_ncl
    return jax.nn.relu(out + identity)


def _assert_close(y, ref, rtol, atol):
    gap = jnp.abs(y - ref) - (atol + rtol * jnp.abs(ref))
    worst = float(jnp.max(gap))
    assert worst <= 0.0, f"max tolerance excess {worst}"


# ----------------------------------------------------------------------------
if __name__ == "__main__":
    key = jax.random.PRNGKey(0)
    k1, k2, k3, k4 = jax.random.split(key, 4)

    # Case 1: small stride-2 bottleneck with a conv1x1+BN downsample.
    # inplanes=64, planes=32 -> width=32, out_channels=128; input (N=2, C=64, L=16).
    params1 = init_bottleneck1d_params(k1, inplanes=64, planes=32, stride=2)
    x1 = jax.random.normal(k2, (2, 64, 16), jnp.float32)
    fwd1 = jax.jit(functools.partial(bottleneck1d_forward, prepare_bottleneck_params(params1)))
    y1 = jax.block_until_ready(fwd1(x1))
    assert y1.shape == (2, 128, 8), y1.shape
    assert jnp.all(jnp.isfinite(y1))
    _assert_close(y1, bottleneck1d_reference(params1, x1), rtol=0.05, atol=0.3)  # bf16 MXU tol

    # Case 2: identity bottleneck (no downsample, stride=1) with a longer sequence
    # so the 512-row M-tiling ("parallel" grid) and the fused residual path are exercised.
    params2 = init_bottleneck1d_params(k3, inplanes=128, planes=32, stride=1)
    x2 = jax.random.normal(k4, (2, 128, 768), jnp.float32)
    fwd2 = jax.jit(functools.partial(bottleneck1d_forward, prepare_bottleneck_params(params2)))
    y2 = jax.block_until_ready(fwd2(x2))
    assert y2.shape == (2, 128, 768), y2.shape
    assert jnp.all(jnp.isfinite(y2))
    _assert_close(y2, bottleneck1d_reference(params2, x2), rtol=0.05, atol=0.3)  # bf16 MXU tol

    print("KERNEL_OK")
</pallas_src>

<mosaic_0001>
module attributes {stable_mosaic.version = 11 : i64} {
  func.func @_pw_bn_act_kernel(%arg0: i32, %arg1: memref<32x64xbf16, #tpu.memory_space<vmem>>, %arg2: memref<64x32xbf16, #tpu.memory_space<vmem>>, %arg3: memref<1x32xf32, #tpu.memory_space<vmem>>, %arg4: memref<1x32xf32, #tpu.memory_space<vmem>>, %arg5: memref<32x32xbf16, #tpu.memory_space<vmem>>) attributes {dimension_semantics = [#tpu.dimension_semantics<parallel>], iteration_bounds = array<i64: 1>, scalar_prefetch = 0 : i64, scratch_operands = 0 : i64, tpu.core_type = #tpu.core_type<tc>, window_params = [{transform_indices = @transform_0, window_bounds = array<i64: 32, 64>}, {pipeline_mode = #tpu.pipeline_mode<synchronous>, transform_indices = @transform_1, window_bounds = array<i64: 64, 32>}, {pipeline_mode = #tpu.pipeline_mode<synchronous>, transform_indices = @transform_2, window_bounds = array<i64: 1, 32>}, {pipeline_mode = #tpu.pipeline_mode<synchronous>, transform_indices = @transform_3, window_bounds = array<i64: 1, 32>}, {transform_indices = @transform_4, window_bounds = array<i64: 32, 32>}]} {
    %c0 = arith.constant 0 : index
    %c0_0 = arith.constant 0 : index
    %0 = vector.load %arg1[%c0, %c0_0] : memref<32x64xbf16, #tpu.memory_space<vmem>>, vector<32x64xbf16>
    %c0_1 = arith.constant 0 : index
    %c0_2 = arith.constant 0 : index
    %1 = vector.load %arg2[%c0_1, %c0_2] : memref<64x32xbf16, #tpu.memory_space<vmem>>, vector<64x32xbf16>
    %cst = arith.constant dense<0.000000e+00> : vector<32x32xf32>
    %2 = tpu.matmul %0, %1, %cst {dimension_numbers = #tpu.dot_dimension_numbers<[1], [0], [0], [1], [0, 0, 1, 1], [], []>} : vector<32x64xbf16>, vector<64x32xbf16>, vector<32x32xf32> -> vector<32x32xf32>
    %c0_3 = arith.constant 0 : index
    %c0_4 = arith.constant 0 : index
    %3 = vector.load %arg3[%c0_3, %c0_4] : memref<1x32xf32, #tpu.memory_space<vmem>>, vector<1x32xf32>
    %4 = vector.broadcast %3 : vector<1x32xf32> to vector<32x32xf32>
    %5 = arith.mulf %2, %4 : vector<32x32xf32>
    %c0_5 = arith.constant 0 : index
    %c0_6 = arith.constant 0 : index
    %6 = vector.load %arg4[%c0_5, %c0_6] : memref<1x32xf32, #tpu.memory_space<vmem>>, vector<1x32xf32>
    %7 = vector.broadcast %6 : vector<1x32xf32> to vector<32x32xf32>
    %8 = arith.addf %5, %7 : vector<32x32xf32>
    %cst_7 = arith.constant 0.000000e+00 : f32
    %9 = vector.broadcast %cst_7 : f32 to vector<32x32xf32>
    %10 = arith.maximumf %8, %9 : vector<32x32xf32>
    %11 = arith.truncf %10 : vector<32x32xf32> to vector<32x32xbf16>
    %c0_8 = arith.constant 0 : index
    %c0_9 = arith.constant 0 : index
    %12 = vector.load %arg5[%c0_8, %c0_9] : memref<32x32xbf16, #tpu.memory_space<vmem>>, vector<32x32xbf16>
    tpu.vector_store %arg5[%c0_8, %c0_9], %11 {strides = array<i32>} : memref<32x32xbf16, #tpu.memory_space<vmem>>, vector<32x32xbf16>,
    return
  }
  func.func @transform_0(%arg0: i32) -> (i32, i32) {
    %c0_i32 = arith.constant 0 : i32
    %c0_i32_0 = arith.constant 0 : i32
    return %arg0, %c0_i32 : i32, i32
  }
  func.func @transform_1(%arg0: i32) -> (i32, i32) {
    %c0_i32 = arith.constant 0 : i32
    %c0_i32_0 = arith.constant 0 : i32
    %c0_i32_1 = arith.constant 0 : i32
    return %c0_i32, %c0_i32_0 : i32, i32
  }
  func.func @transform_2(%arg0: i32) -> (i32, i32) {
    %c0_i32 = arith.constant 0 : i32
    %c0_i32_0 = arith.constant 0 : i32
    %c0_i32_1 = arith.constant 0 : i32
    return %c0_i32, %c0_i32_0 : i32, i32
  }
  func.func @transform_3(%arg0: i32) -> (i32, i32) {
    %c0_i32 = arith.constant 0 : i32
    %c0_i32_0 = arith.constant 0 : i32
    %c0_i32_1 = arith.constant 0 : i32
    return %c0_i32, %c0_i32_0 : i32, i32
  }
  func.func @transform_4(%arg0: i32) -> (i32, i32) {
    %c0_i32 = arith.constant 0 : i32
    %c0_i32_0 = arith.constant 0 : i32
    return %arg0, %c0_i32 : i32, i32
  }
}

module attributes {stable_mosaic.version = 11 : i64} {
  func.func @_conv3tap_bn_relu_kernel(%arg0: i32, %arg1: memref<1x2x9x32xbf16, #tpu.memory_space<vmem>>, %arg2: memref<3x32x32xbf16, #tpu.memory_space<vmem>>, %arg3: memref<1x32xf32, #tpu.memory_space<vmem>>, %arg4: memref<1x32xf32, #tpu.memory_space<vmem>>, %arg5: memref<1x8x32xbf16, #tpu.memory_space<vmem>>) attributes {dimension_semantics = [#tpu.dimension_semantics<parallel>], iteration_bounds = array<i64: 2>, scalar_prefetch = 0 : i64, scratch_operands = 0 : i64, tpu.core_type = #tpu.core_type<tc>, window_params = [{transform_indices = @transform_0, window_bounds = array<i64: 1, 2, 9, 32>}, {pipeline_mode = #tpu.pipeline_mode<synchronous>, transform_indices = @transform_1, window_bounds = array<i64: 3, 32, 32>}, {pipeline_mode = #tpu.pipeline_mode<synchronous>, transform_indices = @transform_2, window_bounds = array<i64: 1, 32>}, {pipeline_mode = #tpu.pipeline_mode<synchronous>, transform_indices = @transform_3, window_bounds = array<i64: 1, 32>}, {transform_indices = @transform_4, window_bounds = array<i64: 1, 8, 32>}]} {
    %c0 = arith.constant 0 : index
    %c0_0 = arith.constant 0 : index
    %c0_1 = arith.constant 0 : index
    %c0_2 = arith.constant 0 : index
    %0 = vector.load %arg1[%c0, %c0_0, %c0_1, %c0_2] : memref<1x2x9x32xbf16, #tpu.memory_space<vmem>>, vector<1x1x8x32xbf16>
    %1 = vector.shape_cast %0 : vector<1x1x8x32xbf16> to vector<8x32xbf16>
    %c0_3 = arith.constant 0 : index
    %c0_4 = arith.constant 0 : index
    %c0_5 = arith.constant 0 : index
    %2 = vector.load %arg2[%c0_3, %c0_4, %c0_5] : memref<3x32x32xbf16, #tpu.memory_space<vmem>>, vector<1x32x32xbf16>
    %3 = vector.shape_cast %2 : vector<1x32x32xbf16> to vector<32x32xbf16>
    %cst = arith.constant dense<0.000000e+00> : vector<8x32xf32>
    %4 = tpu.matmul %1, %3, %cst {dimension_numbers = #tpu.dot_dimension_numbers<[1], [0], [0], [1], [0, 0, 1, 1], [], []>} : vector<8x32xbf16>, vector<32x32xbf16>, vector<8x32xf32> -> vector<8x32xf32>
    %c0_6 = arith.constant 0 : index
    %c1 = arith.constant 1 : index
    %c0_7 = arith.constant 0 : index
    %c0_8 = arith.constant 0 : index
    %5 = vector.load %arg1[%c0_6, %c1, %c0_7, %c0_8] : memref<1x2x9x32xbf16, #tpu.memory_space<vmem>>, vector<1x1x8x32xbf16>
    %6 = vector.shape_cast %5 : vector<1x1x8x32xbf16> to vector<8x32xbf16>
    %c1_9 = arith.constant 1 : index
    %c0_10 = arith.constant 0 : index
    %c0_11 = arith.constant 0 : index
    %7 = vector.load %arg2[%c1_9, %c0_10, %c0_11] : memref<3x32x32xbf16, #tpu.memory_space<vmem>>, vector<1x32x32xbf16>
    %8 = vector.shape_cast %7 : vector<1x32x32xbf16> to vector<32x32xbf16>
    %cst_12 = arith.constant dense<0.000000e+00> : vector<8x32xf32>
    %9 = tpu.matmul %6, %8, %cst_12 {dimension_numbers = #tpu.dot_dimension_numbers<[1], [0], [0], [1], [0, 0, 1, 1], [], []>} : vector<8x32xbf16>, vector<32x32xbf16>, vector<8x32xf32> -> vector<8x32xf32>
    %10 = arith.addf %4, %9 : vector<8x32xf32>
    %c0_13 = arith.constant 0 : index
    %c0_14 = arith.constant 0 : index
    %c1_15 = arith.constant 1 : index
    %c0_16 = arith.constant 0 : index
    %11 = vector.load %arg1[%c0_13, %c0_14, %c1_15, %c0_16] : memref<1x2x9x32xbf16, #tpu.memory_space<vmem>>, vector<1x1x8x32xbf16>
    %12 = vector.shape_cast %11 : vector<1x1x8x32xbf16> to vector<8x32xbf16>
    %c2 = arith.constant 2 : index
    %c0_17 = arith.constant 0 : index
    %c0_18 = arith.constant 0 : index
    %13 = vector.load %arg2[%c2, %c0_17, %c0_18] : memref<3x32x32xbf16, #tpu.memory_space<vmem>>, vector<1x32x32xbf16>
    %14 = vector.shape_cast %13 : vector<1x32x32xbf16> to vector<32x32xbf16>
    %cst_19 = arith.constant dense<0.000000e+00> : vector<8x32xf32>
    %15 = tpu.matmul %12, %14, %cst_19 {dimension_numbers = #tpu.dot_dimension_numbers<[1], [0], [0], [1], [0, 0, 1, 1], [], []>} : vector<8x32xbf16>, vector<32x32xbf16>, vector<8x32xf32> -> vector<8x32xf32>
    %16 = arith.addf %10, %15 : vector<8x32xf32>
    %c0_20 = arith.constant 0 : index
    %c0_21 = arith.constant 0 : index
    %17 = vector.load %arg3[%c0_20, %c0_21] : memref<1x32xf32, #tpu.memory_space<vmem>>, vector<1x32xf32>
    %18 = vector.broadcast %17 : vector<1x32xf32> to vector<8x32xf32>
    %19 = arith.mulf %16, %18 : vector<8x32xf32>
    %c0_22 = arith.constant 0 : index
    %c0_23 = arith.constant 0 : index
    %20 = vector.load %arg4[%c0_22, %c0_23] : memref<1x32xf32, #tpu.memory_space<vmem>>, vector<1x32xf32>
    %21 = vector.broadcast %20 : vector<1x32xf32> to vector<8x32xf32>
    %22 = arith.addf %19, %21 : vector<8x32xf32>
    %cst_24 = arith.constant 0.000000e+00 : f32
    %23 = vector.broadcast %cst_24 : f32 to vector<8x32xf32>
    %24 = arith.maximumf %22, %23 : vector<8x32xf32>
    %25 = arith.truncf %24 : vector<8x32xf32> to vector<8x32xbf16>
    %c0_25 = arith.constant 0 : index
    %c0_26 = arith.constant 0 : index
    %c0_27 = arith.constant 0 : index
    %26 = vector.load %arg5[%c0_25, %c0_26, %c0_27] : memref<1x8x32xbf16, #tpu.memory_space<vmem>>, vector<1x8x32xbf16>
    %27 = vector.shape_cast %26 : vector<1x8x32xbf16> to vector<8x32xbf16>
    %28 = vector.shape_cast %25 : vector<8x32xbf16> to vector<1x8x32xbf16>
    tpu.vector_store %arg5[%c0_25, %c0_26, %c0_27], %28 {strides = array<i32>} : memref<1x8x32xbf16, #tpu.memory_space<vmem>>, vector<1x8x32xbf16>,
    return
  }
  func.func @transform_0(%arg0: i32) -> (i32, i32, i32, i32) {
    %c0_i32 = arith.constant 0 : i32
    %c0_i32_0 = arith.constant 0 : i32
    %c0_i32_1 = arith.constant 0 : i32
    %c0_i32_2 = arith.constant 0 : i32
    return %arg0, %c0_i32, %c0_i32_0, %c0_i32_1 : i32, i32, i32, i32
  }
  func.func @transform_1(%arg0: i32) -> (i32, i32, i32) {
    %c0_i32 = arith.constant 0 : i32
    %c0_i32_0 = arith.constant 0 : i32
    %c0_i32_1 = arith.constant 0 : i32
    %c0_i32_2 = arith.constant 0 : i32
    return %c0_i32, %c0_i32_0, %c0_i32_1 : i32, i32, i32
  }
  func.func @transform_2(%arg0: i32) -> (i32, i32) {
    %c0_i32 = arith.constant 0 : i32
    %c0_i32_0 = arith.constant 0 : i32
    %c0_i32_1 = arith.constant 0 : i32
    return %c0_i32, %c0_i32_0 : i32, i32
  }
  func.func @transform_3(%arg0: i32) -> (i32, i32) {
    %c0_i32 = arith.constant 0 : i32
    %c0_i32_0 = arith.constant 0 : i32
    %c0_i32_1 = arith.constant 0 : i32
    return %c0_i32, %c0_i32_0 : i32, i32
  }
  func.func @transform_4(%arg0: i32) -> (i32, i32, i32) {
    %c0_i32 = arith.constant 0 : i32
    %c0_i32_0 = arith.constant 0 : i32
    %c0_i32_1 = arith.constant 0 : i32
    return %arg0, %c0_i32, %c0_i32_0 : i32, i32, i32
  }
}

module attributes {stable_mosaic.version = 11 : i64} {
  func.func @_pw_bn_dual_add_relu_kernel(%arg0: i32, %arg1: memref<16x32xbf16, #tpu.memory_space<vmem>>, %arg2: memref<32x128xbf16, #tpu.memory_space<vmem>>, %arg3: memref<1x128xf32, #tpu.memory_space<vmem>>, %arg4: memref<1x128xf32, #tpu.memory_space<vmem>>, %arg5: memref<16x64xbf16, #tpu.memory_space<vmem>>, %arg6: memref<64x128xbf16, #tpu.memory_space<vmem>>, %arg7: memref<1x128xf32, #tpu.memory_space<vmem>>, %arg8: memref<1x128xf32, #tpu.memory_space<vmem>>, %arg9: memref<16x128xbf16, #tpu.memory_space<vmem>>) attributes {dimension_semantics = [#tpu.dimension_semantics<parallel>], iteration_bounds = array<i64: 1>, scalar_prefetch = 0 : i64, scratch_operands = 0 : i64, tpu.core_type = #tpu.core_type<tc>, window_params = [{transform_indices = @transform_0, window_bounds = array<i64: 16, 32>}, {pipeline_mode = #tpu.pipeline_mode<synchronous>, transform_indices = @transform_1, window_bounds = array<i64: 32, 128>}, {pipeline_mode = #tpu.pipeline_mode<synchronous>, transform_indices = @transform_2, window_bounds = array<i64: 1, 128>}, {pipeline_mode = #tpu.pipeline_mode<synchronous>, transform_indices = @transform_3, window_bounds = array<i64: 1, 128>}, {transform_indices = @transform_4, window_bounds = array<i64: 16, 64>}, {pipeline_mode = #tpu.pipeline_mode<synchronous>, transform_indices = @transform_5, window_bounds = array<i64: 64, 128>}, {pipeline_mode = #tpu.pipeline_mode<synchronous>, transform_indices = @transform_6, window_bounds = array<i64: 1, 128>}, {pipeline_mode = #tpu.pipeline_mode<synchronous>, transform_indices = @transform_7, window_bounds = array<i64: 1, 128>}, {transform_indices = @transform_8, window_bounds = array<i64: 16, 128>}]} {
    %c0 = arith.constant 0 : index
    %c0_0 = arith.constant 0 : index
    %0 = vector.load %arg1[%c0, %c0_0] : memref<16x32xbf16, #tpu.memory_space<vmem>>, vector<16x32xbf16>
    %c0_1 = arith.constant 0 : index
    %c0_2 = arith.constant 0 : index
    %1 = vector.load %arg2[%c0_1, %c0_2] : memref<32x128xbf16, #tpu.memory_space<vmem>>, vector<32x128xbf16>
    %cst = arith.constant dense<0.000000e+00> : vector<16x128xf32>
    %2 = tpu.matmul %0, %1, %cst {dimension_numbers = #tpu.dot_dimension_numbers<[1], [0], [0], [1], [0, 0, 1, 1], [], []>} : vector<16x32xbf16>, vector<32x128xbf16>, vector<16x128xf32> -> vector<16x128xf32>
    %c0_3 = arith.constant 0 : index
    %c0_4 = arith.constant 0 : index
    %3 = vector.load %arg3[%c0_3, %c0_4] : memref<1x128xf32, #tpu.memory_space<vmem>>, vector<1x128xf32>
    %4 = vector.broadcast %3 : vector<1x128xf32> to vector<16x128xf32>
    %5 = arith.mulf %2, %4 : vector<16x128xf32>
    %c0_5 = arith.constant 0 : index
    %c0_6 = arith.constant 0 : index
    %6 = vector.load %arg4[%c0_5, %c0_6] : memref<1x128xf32, #tpu.memory_space<vmem>>, vector<1x128xf32>
    %7 = vector.broadcast %6 : vector<1x128xf32> to vector<16x128xf32>
    %8 = arith.addf %5, %7 : vector<16x128xf32>
    %c0_7 = arith.constant 0 : index
    %c0_8 = arith.constant 0 : index
    %9 = vector.load %arg5[%c0_7, %c0_8] : memref<16x64xbf16, #tpu.memory_space<vmem>>, vector<16x64xbf16>
    %c0_9 = arith.constant 0 : index
    %c0_10 = arith.constant 0 : index
    %10 = vector.load %arg6[%c0_9, %c0_10] : memref<64x128xbf16, #tpu.memory_space<vmem>>, vector<64x128xbf16>
    %cst_11 = arith.constant dense<0.000000e+00> : vector<16x128xf32>
    %11 = tpu.matmul %9, %10, %cst_11 {dimension_numbers = #tpu.dot_dimension_numbers<[1], [0], [0], [1], [0, 0, 1, 1], [], []>} : vector<16x64xbf16>, vector<64x128xbf16>, vector<16x128xf32> -> vector<16x128xf32>
    %c0_12 = arith.constant 0 : index
    %c0_13 = arith.constant 0 : index
    %12 = vector.load %arg7[%c0_12, %c0_13] : memref<1x128xf32, #tpu.memory_space<vmem>>, vector<1x128xf32>
    %13 = vector.broadcast %12 : vector<1x128xf32> to vector<16x128xf32>
    %14 = arith.mulf %11, %13 : vector<16x128xf32>
    %c0_14 = arith.constant 0 : index
    %c0_15 = arith.constant 0 : index
    %15 = vector.load %arg8[%c0_14, %c0_15] : memref<1x128xf32, #tpu.memory_space<vmem>>, vector<1x128xf32>
    %16 = vector.broadcast %15 : vector<1x128xf32> to vector<16x128xf32>
    %17 = arith.addf %14, %16 : vector<16x128xf32>
    %18 = arith.addf %8, %17 : vector<16x128xf32>
    %cst_16 = arith.constant 0.000000e+00 : f32
    %19 = vector.broadcast %cst_16 : f32 to vector<16x128xf32>
    %20 = arith.maximumf %18, %19 : vector<16x128xf32>
    %21 = arith.truncf %20 : vector<16x128xf32> to vector<16x128xbf16>
    %c0_17 = arith.constant 0 : index
    %c0_18 = arith.constant 0 : index
    %22 = vector.load %arg9[%c0_17, %c0_18] : memref<16x128xbf16, #tpu.memory_space<vmem>>, vector<16x128xbf16>
    tpu.vector_store %arg9[%c0_17, %c0_18], %21 {strides = array<i32>} : memref<16x128xbf16, #tpu.memory_space<vmem>>, vector<16x128xbf16>,
    return
  }
  func.func @transform_0(%arg0: i32) -> (i32, i32) {
    %c0_i32 = arith.constant 0 : i32
    %c0_i32_0 = arith.constant 0 : i32
    return %arg0, %c0_i32 : i32, i32
  }
  func.func @transform_1(%arg0: i32) -> (i32, i32) {
    %c0_i32 = arith.constant 0 : i32
    %c0_i32_0 = arith.constant 0 : i32
    %c0_i32_1 = arith.constant 0 : i32
    return %c0_i32, %c0_i32_0 : i32, i32
  }
  func.func @transform_2(%arg0: i32) -> (i32, i32) {
    %c0_i32 = arith.constant 0 : i32
    %c0_i32_0 = arith.constant 0 : i32
    %c0_i32_1 = arith.constant 0 : i32
    return %c0_i32, %c0_i32_0 : i32, i32
  }
  func.func @transform_3(%arg0: i32) -> (i32, i32) {
    %c0_i32 = arith.constant 0 : i32
    %c0_i32_0 = arith.constant 0 : i32
    %c0_i32_1 = arith.constant 0 : i32
    return %c0_i32, %c0_i32_0 : i32, i32
  }
  func.func @transform_4(%arg0: i32) -> (i32, i32) {
    %c0_i32 = arith.constant 0 : i32
    %c0_i32_0 = arith.constant 0 : i32
    return %arg0, %c0_i32 : i32, i32
  }
  func.func @transform_5(%arg0: i32) -> (i32, i32) {
    %c0_i32 = arith.constant 0 : i32
    %c0_i32_0 = arith.constant 0 : i32
    %c0_i32_1 = arith.constant 0 : i32
    return %c0_i32, %c0_i32_0 : i32, i32
  }
  func.func @transform_6(%arg0: i32) -> (i32, i32) {
    %c0_i32 = arith.constant 0 : i32
    %c0_i32_0 = arith.constant 0 : i32
    %c0_i32_1 = arith.constant 0 : i32
    return %c0_i32, %c0_i32_0 : i32, i32
  }
  func.func @transform_7(%arg0: i32) -> (i32, i32) {
    %c0_i32 = arith.constant 0 : i32
    %c0_i32_0 = arith.constant 0 : i32
    %c0_i32_1 = arith.constant 0 : i32
    return %c0_i32, %c0_i32_0 : i32, i32
  }
  func.func @transform_8(%arg0: i32) -> (i32, i32) {
    %c0_i32 = arith.constant 0 : i32
    %c0_i32_0 = arith.constant 0 : i32
    return %arg0, %c0_i32 : i32, i32
  }
}

</mosaic_0001>

<bundles_post_ra>
// kernel: bottleneck1d_forward.3
= control target key start
LH: loop header
LB: loop body
LE: loop exit
PB: predicated region body
PF: predicated region fallthrough
CT: control target
= control target key end

     0   :  { %vm64_vm0 = vcmask 523264   ;;  %vm162_vm1 = vcmask 257024   ;;  %s274_s1 = inlined_call_operand.vmem [shape: bf16[64,32], index: 1, kind: input, shape index: {}]   ;;  %s275_s0 = inlined_call_operand.vmem [shape: bf16[32,64], index: 0, kind: input, shape index: {}]   ;;  %s276_s2 = inlined_call_operand.vmem [shape: f32[1,32], index: 2, kind: input, shape index: {}]   ;;  %s277_s3 = inlined_call_operand.vmem [shape: f32[1,32], index: 3, kind: input, shape index: {}]   ;;  %s278_s4 = inlined_call_operand.vmem [shape: bf16[32,32], index: 4, kind: output, shape index: {}]  }
   0x1   :  { %v207_v0 = vld [vmem:[%s274_s1] sm:$0xff]   ;;  %v208_v1 = vld [vmem:[%s274_s1 + $0x8] sm:$0xff]   ;;  %v209_v2 = vld [vmem:[%s274_s1 + $0x10] sm:$0xff]  }
   0x2   :  { %195 = vmatprep.subr.bf16.mxu0 %v207_v0  ;;  %v211_v3 = vld [vmem:[%s275_s0] sm:$0xff]   ;;  %v210_v4 = vld [vmem:[%s274_s1 + $0x18] sm:$0xff]   ;;  %v212_v5 = vld [vmem:[%s275_s0 + $0x8] sm:$0xff]  }
   0x3   :  { %196 = vmatpush3.bf16.msra.mxu0 %v207_v0  ;;  %203 = vmatprep.mubr.msk.bf16.mxu0 %vm64_vm0, %v211_v3  ;;  %v179_v6 = vld [vmem:[%s276_s2] ss:$0 sm:$0xff] }
   0x4   :  { %197 = vmatprep.subr.bf16.mxu0 %v208_v1  ;;  %v180_v8 = vld [vmem:[%s277_s3] ss:$0 sm:$0xff] }
   0x7   :  { %198 = vmatpush3.bf16.msra.mxu0 %v208_v1 }
   0x8   :  { %199 = vmatprep.subr.bf16.mxu0 %v209_v2 }
   0xb   :  { %200 = vmatpush3.bf16.msra.mxu0 %v209_v2 }
   0xc   :  { %201 = vmatprep.subr.bf16.mxu0 %v210_v4 }
   0xf   :  { %202 = vmatpush3.bf16.msra.mxu0 %v210_v4 }
  0x12   :  { %204 = vmatmul.mubr.msk.bf16.vlgmr.msra.gmra.mrb[0].mxu0 %vm64_vm0, %v212_v5 }
  0xe5   :  { %v205_v7 = vpop.f32.mrb[0].mxu0 }
  0xe6   :  { %v129_v9 = vmul.f32 %v205_v7, %v179_v6  ;;  %v105_v10 = vpop.f32.mrb[1].mxu0 }
  0xe7   :  { %v127_v11 = vmul.f32 %v179_v6, %v105_v10  ;;  %v206_v12 = vpop.f32.mrb[2].mxu0 }
  0xe8   :  { %v140_v13 = vadd.f32 %v180_v8, %v129_v9  ;;  %v130_v14 = vmul.f32 %v206_v12, %v179_v6  ;;  %v108_v15 = vpop.f32.mrb[3].mxu0 }
  0xe9   :  { %v138_v16 = vadd.f32 %v180_v8, %v127_v11  ;;  %v128_v17 = vmul.f32 %v179_v6, %v108_v15 }
  0xea   :  { %v144_v18 = vmax.f32 %v140_v13, 0.0  ;;  %v141_v19 = vadd.f32 %v180_v8, %v130_v14 }
  0xeb   :  { %v142_v20 = vmax.f32 %v138_v16, 0.0  ;;  %v139_v21 = vadd.f32 %v180_v8, %v128_v17 }
  0xec   :  { %v187_v22 = vpack.c.bf16 %v144_v18, %v144_v18  ;;  %v145_v23 = vmax.f32 %v141_v19, 0.0 }
  0xed   :  { %v185_v24 = vpack.c.bf16 %v142_v20, %v142_v20  ;;  %v143_v25 = vmax.f32 %v139_v21, 0.0 }
  0xee   :  { %165 = vst.msk [vmem:[%s278_s4 + $0x8] sm:$0xf] %vm162_vm1, %v187_v22  ;;  %v188_v26 = vpack.c.bf16 %v145_v23, %v145_v23 }
  0xef   :  { %163 = vst.msk [vmem:[%s278_s4] sm:$0xf] %vm162_vm1, %v185_v24  ;;  %v186_v27 = vpack.c.bf16 %v143_v25, %v143_v25 }
  0xf0   :  { %166 = vst.msk [vmem:[%s278_s4 + $0xc] sm:$0xf] %vm162_vm1, %v188_v26 }
  0xf1   :  { %164 = vst.msk [vmem:[%s278_s4 + $0x4] sm:$0xf] %vm162_vm1, %v186_v27 }

// kernel: bottleneck1d_forward.4
= control target key start
LH: loop header
LB: loop body
LE: loop exit
PB: predicated region body
PF: predicated region fallthrough
CT: control target
= control target key end

     0   :  { %s590_s15 = smov 0   ;;  %s641_s0 = inlined_call_operand.vmem [shape: bf16[2,2,9,32], index: 0, kind: input, shape index: {}]   ;;  %s642_s1 = inlined_call_operand.vmem [shape: bf16[3,32,32], index: 1, kind: input, shape index: {}]   ;;  %s643_s2 = inlined_call_operand.vmem [shape: f32[1,32], index: 2, kind: input, shape index: {}]   ;;  %s644_s3 = inlined_call_operand.vmem [shape: f32[1,32], index: 3, kind: input, shape index: {}]   ;;  %s645_s4 = inlined_call_operand.vmem [shape: bf16[2,8,32], index: 4, kind: output, shape index: {}]  }
   0x1 LB: > { %s468_s16 = sadd.s32 4294967295, %s561_s15   ;;  %p472_p0 = scmp.ge.s32.totalorder %s561_s15, 1  ;;  %s561_s15 = sphi %s590_s15, %s14_s15  }
   0x2   : > { %p162_p1 = scmp.lt.s32.totalorder %s561_s15, 3 }
   0x4   : > { %p163_p2 = pnand %p472_p0, %p162_p1 }
   0x5   : > { %v548_v0 = vld [vmem:[%s642_s1] sm:$0xff] (!%p163_p2)   ;;  %v563_v1 = vmov (!%p163_p2), 0.0   ;;  %v549_v2 = vld [vmem:[%s642_s1 + $0x8] sm:$0xff] (!%p163_p2)   ;;  %vm564_vm0 = vmmov (!%p163_p2), 0   ;;  %p187_p3 = scmp.lt.s32.totalorder (!%p163_p2), %s468_s16, 1  ;;  %v552_v3 = vld [vmem:[%s642_s1 + $0x10] sm:$0xff] (!%p163_p2)  }
   0x6   : > { %166 = sbr.rel (%p163_p2) target bundleno = 252 (0xfc), region = 36  ;;  %517 = vmatprep.subr.bf16.mxu0 (!%p163_p2), %v563_v1  ;;  %509 = vmatprep.subr.bf16.mxu1 (!%p163_p2), %v563_v1  ;;  %vm221_vm1 = vcmask (!%p163_p2), 261120   ;;  %v551_v4 = vld [vmem:[%s642_s1 + $0x20] sm:$0xff] (!%p163_p2)   ;;  %v553_v5 = vld [vmem:[%s642_s1 + $0x18] sm:$0xff] (!%p163_p2)   ;;  %v554_v8 = vld [vmem:[%s642_s1 + $0x28] sm:$0xff] (!%p163_p2)   ;;  %vm413_vm2 = vcmask (!%p163_p2), 257024  }
   0x7   : > { %518 = vmatpush3.bf16.msra.mxu0 (!%p163_p2), %v548_v0  ;;  %521 = vmatprep.mubr.msk.bf16.mxu0 (!%p163_p2), %vm564_vm0, %v563_v1  ;;  %v495_v19 = vld [vmem:[%s643_s2] ss:$0 sm:$0xff] (!%p163_p2) }
   0x8   : > { %519 = vmatprep.subr.bf16.mxu0 (!%p163_p2), %v563_v1  ;;  %513 = vmatprep.mubr.msk.bf16.mxu1 (!%p163_p2), %vm564_vm0, %v563_v1  ;;  %v496_v22 = vld [vmem:[%s644_s3] ss:$0 sm:$0xff] (!%p163_p2) }
   0x9   : > { %510 = vmatpush3.bf16.msra.mxu1 (!%p163_p2), %v552_v3 }
   0xa   : > { %511 = vmatprep.subr.bf16.mxu1 (!%p163_p2), %v563_v1 }
   0xb   : > { %520 = vmatpush3.bf16.msra.mxu0 (!%p163_p2), %v549_v2 }
   0xc   : > { %525 = vmatprep.subr.bf16.mxu0 (!%p163_p2), %v563_v1 }
   0xd   : > { %s647_s16 = smov (!%p187_p3, %s468_s16), 1  ;;  %512 = vmatpush3.bf16.msra.mxu1 %v553_v5 }
   0xe   : > { %s499_s23 = sshll.u32 %s647_s16, 4  ;;  %s475_s11 = sshll.u32 %s647_s16, 2 }
   0xf   : > { %s191_s30 = scalar_lea.vmem %s641_s0, %s499_s23  ;;  %s195_s14 = scalar_lea.vmem %s645_s4, %s475_s11 }
  0x10   : > { %v197_v6 = vld [vmem:[%s191_s30] sm:$0xf]  ;;  %v476_v9 = vld [vmem:[%s191_s30 + $0x8] sm:$0xf] }
  0x11   : > { %522 = vmatmul.mubr.msk.bf16.vlgmr.msra.gmra.mrb[0].mxu0 %vm221_vm1, %v197_v6  ;;  %v550_v7 = vld [vmem:[%s191_s30] sm:$0x1f]   ;;  %514 = vmatmul.mubr.msk.bf16.vlgmr.msra.gmra.mrb[0].mxu1 %vm221_vm1, %v476_v9 }
  0x12   : > { %526 = vmatpush3.bf16.msra.mxu0 %v551_v4  ;;  %529 = vmatprep.mubr.msk.bf16.mxu0 %vm564_vm0, %v563_v1  ;;  %v335_v10 = vshll.u32 %v550_v7, 16  ;;  %v333_v11 = vshrl.u32 %v550_v7, 16 }
  0x13   : > { %527 = vmatprep.subr.bf16.mxu0 %v563_v1 }
  0x14   : > { %v337_v12 = vrot.slane %v335_v10, 1 }
  0x16   : > { %528 = vmatpush3.bf16.msra.mxu0 %v554_v8  ;;  %v338_v13 = vor.u32 %v337_v12, %v333_v11 }
  0x1d   : > { %530 = vmatmul.mubr.msk.bf16.vlgmr.msra.gmra.mrb[0].mxu0 %vm221_vm1, %v338_v13 }
  0xe4   : > { %v259_v14 = vpop.f32.mrb[0].mxu1 }
  0xe5   : > { %v515_v15 = vpop.f32.mrb[1].mxu1 }
  0xe6   : > { %v262_v16 = vpop.f32.mrb[2].mxu1 }
  0xe7   : > { %v516_v17 = vpop.f32.mrb[3].mxu1 }
  0xf0   : > { %v388_v18 = vpop.f32.mrb[0].mxu0 }
  0xf1   : > { %v533_v20 = vadd.f32 %v388_v18, %v259_v14  ;;  %v531_v21 = vpop.f32.mrb[1].mxu0 }
  0xf2   : > { %v391_v23 = vpop.f32.mrb[2].mxu0 }
  0xf3   : > { %v402_v24 = vmul.f32 %v533_v20, %v495_v19  ;;  %v532_v25 = vpop.f32.mrb[3].mxu0 }
  0xf5   : > { %v410_v26 = vadd.f32 %v496_v22, %v402_v24 }
  0xf7   : > { %v411_v27 = vmax.f32 %v410_v26, 0.0 }
  0xf9   : > { %v412_v28 = vpack.c.bf16 %v411_v27, %v411_v27 }
  0xfb   : > { %414 = vst.msk [vmem:[%s195_s14] sm:$0xf] %vm413_vm2, %v412_v28 }
  0xfc PF: > { %s14_s15 = sadd.s32 1, %s561_s15  }
  0xfd   : > { %p11_p4 = scmp.ge.s32.totalorder %s14_s15, 4  }
  0xff   :  { %13 = sbr.rel (!%p11_p4) target bundleno = 1 (0x1), region = 69 }

// kernel: bottleneck1d_forward.5
= control target key start
LH: loop header
LB: loop body
LE: loop exit
PB: predicated region body
PF: predicated region fallthrough
CT: control target
= control target key end

     0   :  { %v297_v0 = vmov 0.0   ;;  %vm298_vm0 = vmmov 0   ;;  %vm53_vm1 = vcmask 261120   ;;  %vm155_vm2 = vcmask 523264   ;;  %s383_s5 = inlined_call_operand.vmem [shape: bf16[64,128], index: 5, kind: input, shape index: {}]   ;;  %s384_s1 = inlined_call_operand.vmem [shape: bf16[32,128], index: 1, kind: input, shape index: {}]   ;;  %s385_s0 = inlined_call_operand.vmem [shape: bf16[16,32], index: 0, kind: input, shape index: {}]   ;;  %s386_s4 = inlined_call_operand.vmem [shape: bf16[16,64], index: 4, kind: input, shape index: {}]   ;;  %s387_s2 = inlined_call_operand.vmem [shape: f32[1,128], index: 2, kind: input, shape index: {}]   ;;  %s388_s3 = inlined_call_operand.vmem [shape: f32[1,128], index: 3, kind: input, shape index: {}]   ;;  %s389_s6 = inlined_call_operand.vmem [shape: f32[1,128], index: 6, kind: input, shape index: {}]   ;;  %s390_s7 = inlined_call_operand.vmem [shape: f32[1,128], index: 7, kind: input, shape index: {}]   ;;  %s391_s8 = inlined_call_operand.vmem [shape: bf16[16,128], index: 8, kind: output, shape index: {}]  }
   0x1   :  { %275 = vmatprep.subr.bf16.mxu1 %v297_v0  ;;  %v289_v1 = vld [vmem:[%s383_s5] sm:$0xff]   ;;  %267 = vmatprep.subr.bf16.mxu0 %v297_v0  ;;  %v290_v2 = vld [vmem:[%s383_s5 + $0x8] sm:$0xff]   ;;  %v292_v5 = vld [vmem:[%s383_s5 + $0x10] sm:$0xff]  }
   0x2   :  { %271 = vmatprep.mubr.msk.bf16.mxu0 %vm298_vm0, %v297_v0  ;;  %283 = vmatprep.mubr.msk.bf16.mxu1 %vm298_vm0, %v297_v0  ;;  %v291_v3 = vld [vmem:[%s384_s1] sm:$0xff]   ;;  %v293_v4 = vld [vmem:[%s384_s1 + $0x8] sm:$0xff]   ;;  %v295_v7 = vld [vmem:[%s383_s5 + $0x18] sm:$0xff]  }
   0x3   :  { %276 = vmatpush3.bf16.msra.mxu1 %v289_v1  ;;  %268 = vmatpush3.bf16.msra.mxu0 %v291_v3  ;;  %v294_v6 = vld [vmem:[%s385_s0] sm:$0xff]  }
   0x4   :  { %277 = vmatprep.subr.bf16.mxu1 %v297_v0  ;;  %269 = vmatprep.subr.bf16.mxu0 %v297_v0  ;;  %v296_v8 = vld [vmem:[%s386_s4] sm:$0xff]  }
   0x5   :  { %v240_v10 = vld [vmem:[%s387_s2] ss:$0 sm:$0xff] }
   0x6   :  { %v241_v15 = vld [vmem:[%s388_s3] ss:$0 sm:$0xff] }
   0x7   :  { %278 = vmatpush3.bf16.msra.mxu1 %v290_v2  ;;  %270 = vmatpush3.bf16.msra.mxu0 %v293_v4  ;;  %v248_v16 = vld [vmem:[%s389_s6] ss:$0 sm:$0xff] }
   0x8   :  { %279 = vmatprep.subr.bf16.mxu1 %v297_v0  ;;  %v249_v18 = vld [vmem:[%s390_s7] ss:$0 sm:$0xff] }
   0xa   :  { %272 = vmatmul.mubr.msk.bf16.vlgmr.msra.gmra.mrb[0].mxu0 %vm53_vm1, %v294_v6 }
   0xb   :  { %280 = vmatpush3.bf16.msra.mxu1 %v292_v5 }
   0xc   :  { %281 = vmatprep.subr.bf16.mxu1 %v297_v0 }
   0xf   :  { %282 = vmatpush3.bf16.msra.mxu1 %v295_v7 }
  0x12   :  { %284 = vmatmul.mubr.msk.bf16.vlgmr.msra.gmra.mrb[0].mxu1 %vm155_vm2, %v296_v8 }
  0xdd   :  { %v91_v9 = vpop.f32.mrb[0].mxu0 }
  0xde   :  { %v273_v11 = vpop.f32.mrb[1].mxu0  ;;  %v105_v13 = vmul.f32 %v240_v10, %v91_v9 }
  0xdf   :  { %v94_v12 = vpop.f32.mrb[2].mxu0 }
  0xe0   :  { %v274_v14 = vpop.f32.mrb[3].mxu0  ;;  %v114_v19 = vadd.f32 %v241_v15, %v105_v13  ;;  %v106_v20 = vmul.f32 %v240_v10, %v94_v12 }
  0xe2   :  { %v115_v27 = vadd.f32 %v241_v15, %v106_v20 }
  0xe5   :  { %v193_v17 = vpop.f32.mrb[0].mxu1 }
  0xe6   :  { %v207_v21 = vmul.f32 %v248_v16, %v193_v17  ;;  %v285_v22 = vpop.f32.mrb[1].mxu1 }
  0xe7   :  { %v196_v23 = vpop.f32.mrb[2].mxu1 }
  0xe8   :  { %v216_v24 = vadd.f32 %v249_v18, %v207_v21  ;;  %v208_v25 = vmul.f32 %v248_v16, %v196_v23  ;;  %v286_v26 = vpop.f32.mrb[3].mxu1 }
  0xea   :  { %v218_v28 = vadd.f32 %v216_v24, %v114_v19  ;;  %v217_v29 = vadd.f32 %v249_v18, %v208_v25 }
  0xec   :  { %v219_v30 = vadd.f32 %v217_v29, %v115_v27  ;;  %v220_v31 = vmax.f32 %v218_v28, 0.0 }
  0xee   :  { %v221_v32 = vmax.f32 %v219_v30, 0.0 }
  0xf0   :  { %v257_v33 = vpack.c.bf16 %v221_v32, %v220_v31 }
  0xf2   :  { %258 = vst [vmem:[%s391_s8] sm:$0xff] %v257_v33  }

</bundles_post_ra>
